<compile_context>
chip_gen: v7x
topology: tpu7x:2x2x1
jax: 0.10.0
libtpu: 0.0.40
codegen_flags: <defaults>
</compile_context>

<pallas_src>
import functools
import math

import jax
import jax.numpy as jnp
from jax import lax
from jax.experimental import pallas as pl
from jax.experimental.pallas import tpu as pltpu


# -----------------------------------------------------------------------------
# Kernel 1: fused qkv projection + RoPE (+ 1/sqrt(hd) folded into q columns)
# -----------------------------------------------------------------------------
def _qkv_rope_kernel(x_ref, w_ref, cos_ref, ss_ref, q_ref, k_ref, v_ref,
                     acc_ref, *, n_head, n_kv, head_dim):
    di = pl.program_id(2)
    nd = pl.num_programs(2)

    @pl.when(di == 0)
    def _init():
        acc_ref[...] = jnp.zeros(acc_ref.shape, jnp.float32)

    # (ts, td) @ (td, HQ + 2*HKV), contraction (model dim) tiled over the grid.
    acc_ref[...] += jnp.dot(x_ref[0], w_ref[...],
                            preferred_element_type=jnp.float32)

    @pl.when(di == nd - 1)
    def _finalize():
        hd = head_dim
        half = hd // 2
        hq = n_head * hd
        wqk = (n_head + n_kv) * hd

        qkv = acc_ref[...]                     # (ts, HQ + 2*HKV) f32
        qk = qkv[:, :wqk]                      # q and k columns (RoPE'd below)

        # Rotate-half partner: every head block is [even half | odd half]
        # (weight columns pre-permuted on the host), so each column's partner
        # lives exactly +/- half lanes away.  Two full-width rolls + one select
        # build it with no per-head slicing.  (jnp.roll lowers to two static
        # lane slices + concat; pltpu.roll(qk, shift, axis=1) is a drop-in at
        # production 128-lane-aligned widths.)
        fwd = jnp.roll(qk, half, axis=1)       # correct partner for odd halves
        bwd = jnp.roll(qk, -half, axis=1)      # correct partner for even halves
        col = lax.broadcasted_iota(jnp.int32, qk.shape, 1)
        odd_half = (col % hd) >= half
        partner = jnp.where(odd_half, fwd, bwd)

        # Full-width RoPE: cos / signed-sin tables are host-pretiled to slab
        # width; 1/sqrt(head_dim) is already folded into their q columns.
        rot = qk * cos_ref[...] + partner * ss_ref[...]

        # Head-major stores — each slice/store is a full head_dim (128 lanes in
        # production), so no half-width XLU repack and no masked vst epilogue.
        for h in range(n_head):
            q_ref[0, h] = rot[:, h * hd:(h + 1) * hd].astype(q_ref.dtype)
        for h in range(n_kv):
            k_ref[0, h] = rot[:, hq + h * hd:hq + (h + 1) * hd].astype(k_ref.dtype)
            v_ref[0, h] = qkv[:, wqk + h * hd:wqk + (h + 1) * hd].astype(v_ref.dtype)


# -----------------------------------------------------------------------------
# Kernel 2: causal flash attention, whole GQA group per program
# -----------------------------------------------------------------------------
def _flash_attn_kernel(q_ref, k_ref, v_ref, o_ref, m_sc, l_sc, acc_sc,
                       *, rep, tq, tkv, head_dim):
    qi = pl.program_id(2)
    ki = pl.program_id(3)

    @pl.when(ki == 0)
    def _init():
        m_sc[...] = jnp.full(m_sc.shape, -jnp.inf, jnp.float32)
        l_sc[...] = jnp.zeros(l_sc.shape, jnp.float32)
        acc_sc[...] = jnp.zeros(acc_sc.shape, jnp.float32)

    # Tiles strictly above the causal diagonal do no compute; their K/V DMA is
    # also skipped because the k/v index_map clamps the block index to
    # min(ki, qi) (revisited blocks are not re-copied by the pipeline).
    @pl.when(ki <= qi)
    def _compute():
        # GQA fold: (rep, tq, hd) -> (rep*tq, hd) is a free collapse of the
        # leading dims and raises the score-matmul M dim to rep*tq.
        q = q_ref[0].reshape(rep * tq, head_dim)   # scale pre-folded into q
        k = k_ref[0, 0]                             # (tkv, hd)
        v = v_ref[0, 0]                             # (tkv, hd)

        # Contract last dims directly — no explicit k transpose.
        s = lax.dot_general(q, k, (((1,), (1,)), ((), ())),
                            preferred_element_type=jnp.float32)  # (rep*tq, tkv)

        # In-kernel causal mask; query rows repeat per head inside the group.
        row = qi * tq + (lax.broadcasted_iota(jnp.int32, s.shape, 0) % tq)
        col = ki * tkv + lax.broadcasted_iota(jnp.int32, s.shape, 1)
        s = jnp.where(row >= col, s, -jnp.inf)

        m_prev = m_sc[...]
        m_new = jnp.maximum(m_prev, jnp.max(s, axis=-1, keepdims=True))
        alpha = jnp.exp(m_prev - m_new)
        p = jnp.exp(s - m_new)

        l_sc[...] = alpha * l_sc[...] + jnp.sum(p, axis=-1, keepdims=True)
        acc_sc[...] = alpha * acc_sc[...] + jnp.dot(
            p.astype(v.dtype), v, preferred_element_type=jnp.float32)
        m_sc[...] = m_new

    # ki == qi is the last tile at/below the diagonal for this query block;
    # the remaining ki steps for the same qi are empty.
    @pl.when(ki == qi)
    def _finalize():
        # Exact reciprocal keeps the f32 test tolerance; use approx=True (EUP
        # slot, effectively free) for production bf16 kernels.
        out = acc_sc[...] * pl.reciprocal(l_sc[...], approx=False)
        for r in range(rep):
            o_ref[0, 0, :, r * head_dim:(r + 1) * head_dim] = (
                out[r * tq:(r + 1) * tq].astype(o_ref.dtype))


# -----------------------------------------------------------------------------
# Kernel 3: output projection  y @ wo  (contraction tiled over kv groups,
# output tiled over S and D; no repacking — y is already lane-dense per group)
# -----------------------------------------------------------------------------
def _wo_proj_kernel(y_ref, wo_ref, o_ref, acc_ref):
    ci = pl.program_id(3)
    nc = pl.num_programs(3)

    @pl.when(ci == 0)
    def _init():
        acc_ref[...] = jnp.zeros(acc_ref.shape, jnp.float32)

    # One wide (tr, rep*hd) @ (rep*hd, tn) matmul per contraction step.
    acc_ref[...] += jnp.dot(y_ref[0, 0], wo_ref[...],
                            preferred_element_type=jnp.float32)

    @pl.when(ci == nc - 1)
    def _finalize():
        o_ref[0] = acc_ref[...].astype(o_ref.dtype)


# -----------------------------------------------------------------------------
# Wrapper
# -----------------------------------------------------------------------------
def attention_pallas(x, wqkv_t, wo_t, cos_full, ss_full, *, n_head, n_kv,
                     head_dim, ts=None, td=None, tq=None, tkv=None,
                     tr=None, tn=None, vmem_limit_bytes=48 * 1024 * 1024):
    """x:(B,S,D); wqkv_t:(D, HQ+2*HKV) (head-major, per-head [even|odd] q/k
    columns); wo_t:(HQ,D); cos_full/ss_full:(S,(n_head+n_kv)*head_dim) pretiled
    RoPE tables (scale folded into q columns).  Causal attention."""
    B, S, D = x.shape
    hd = head_dim
    assert hd % 2 == 0 and n_head % n_kv == 0
    rep = n_head // n_kv
    hq = n_head * hd
    hk = n_kv * hd
    w_all = hq + 2 * hk
    wqk = hq + hk
    assert wqkv_t.shape == (D, w_all) and wo_t.shape == (hq, D)
    assert cos_full.shape == (S, wqk) and ss_full.shape == (S, wqk)

    # Tile defaults sized for v6e/v7x (256-row / 512-col MXU-friendly tiles);
    # shrink td / tn (or use bf16 weights) to respect v7x's 64 MiB VMEM, raise
    # vmem_limit_bytes toward ~100 MiB on v5e/v6e.
    ts = min(S, 256) if ts is None else ts
    td = min(D, 512) if td is None else td
    tq = min(S, 256) if tq is None else tq
    tkv = tq if tkv is None else tkv
    tr = min(S, 256) if tr is None else tr
    tn = min(D, 512) if tn is None else tn
    assert S % ts == 0 and D % td == 0
    assert S % tq == 0 and S % tkv == 0
    assert tq == tkv, "causal K/V clamp requires tq == tkv"
    assert S % tr == 0 and D % tn == 0

    # ---- 1) fused qkv projection + RoPE -------------------------------------
    qkv_kernel = functools.partial(_qkv_rope_kernel, n_head=n_head, n_kv=n_kv,
                                   head_dim=hd)
    q, k, v = pl.pallas_call(
        qkv_kernel,
        out_shape=(
            jax.ShapeDtypeStruct((B, n_head, S, hd), x.dtype),
            jax.ShapeDtypeStruct((B, n_kv, S, hd), x.dtype),
            jax.ShapeDtypeStruct((B, n_kv, S, hd), x.dtype),
        ),
        grid=(B, S // ts, D // td),
        in_specs=[
            pl.BlockSpec((1, ts, td), lambda b, si, di: (b, si, di)),
            pl.BlockSpec((td, w_all), lambda b, si, di: (di, 0)),
            pl.BlockSpec((ts, wqk), lambda b, si, di: (si, 0)),
            pl.BlockSpec((ts, wqk), lambda b, si, di: (si, 0)),
        ],
        out_specs=(
            pl.BlockSpec((1, n_head, ts, hd), lambda b, si, di: (b, 0, si, 0)),
            pl.BlockSpec((1, n_kv, ts, hd), lambda b, si, di: (b, 0, si, 0)),
            pl.BlockSpec((1, n_kv, ts, hd), lambda b, si, di: (b, 0, si, 0)),
        ),
        scratch_shapes=[pltpu.VMEM((ts, w_all), jnp.float32)],
        compiler_params=pltpu.CompilerParams(
            dimension_semantics=("parallel", "parallel", "arbitrary"),
            vmem_limit_bytes=vmem_limit_bytes),
    )(x, wqkv_t, cos_full, ss_full)

    # ---- 2) causal flash attention, GQA group folded per program ------------
    flash_kernel = functools.partial(_flash_attn_kernel, rep=rep, tq=tq,
                                     tkv=tkv, head_dim=hd)
    y = pl.pallas_call(
        flash_kernel,
        out_shape=jax.ShapeDtypeStruct((B, n_kv, S, rep * hd), x.dtype),
        grid=(B, n_kv, S // tq, S // tkv),
        in_specs=[
            pl.BlockSpec((1, rep, tq, hd), lambda b, g, qi, ki: (b, g, qi, 0)),
            pl.BlockSpec((1, 1, tkv, hd),
                         lambda b, g, qi, ki: (b, g, jnp.minimum(ki, qi), 0)),
            pl.BlockSpec((1, 1, tkv, hd),
                         lambda b, g, qi, ki: (b, g, jnp.minimum(ki, qi), 0)),
        ],
        out_specs=pl.BlockSpec((1, 1, tq, rep * hd),
                               lambda b, g, qi, ki: (b, g, qi, 0)),
        scratch_shapes=[
            pltpu.VMEM((rep * tq, 1), jnp.float32),    # running max
            pltpu.VMEM((rep * tq, 1), jnp.float32),    # running sum
            pltpu.VMEM((rep * tq, hd), jnp.float32),   # output accumulator
        ],
        compiler_params=pltpu.CompilerParams(
            dimension_semantics=("parallel", "parallel", "parallel", "arbitrary"),
            vmem_limit_bytes=vmem_limit_bytes),
    )(q, k, v)

    # ---- 3) output projection ------------------------------------------------
    out = pl.pallas_call(
        _wo_proj_kernel,
        out_shape=jax.ShapeDtypeStruct((B, S, D), x.dtype),
        grid=(B, S // tr, D // tn, n_kv),
        in_specs=[
            pl.BlockSpec((1, 1, tr, rep * hd),
                         lambda b, si, ni, ci: (b, ci, si, 0)),
            pl.BlockSpec((rep * hd, tn), lambda b, si, ni, ci: (ci, ni)),
        ],
        out_specs=pl.BlockSpec((1, tr, tn), lambda b, si, ni, ci: (b, si, ni)),
        scratch_shapes=[pltpu.VMEM((tr, tn), jnp.float32)],
        compiler_params=pltpu.CompilerParams(
            dimension_semantics=("parallel", "parallel", "parallel", "arbitrary"),
            vmem_limit_bytes=vmem_limit_bytes),
    )(y, wo_t)

    return out


# -----------------------------------------------------------------------------
# Host-side operand preparation (RoPE column permutation, wqkv fusion, tables)
# -----------------------------------------------------------------------------
def _per_head_even_odd_perm(n_heads, head_dim):
    cols = []
    for h in range(n_heads):
        base = h * head_dim
        cols.append(base + jnp.arange(0, head_dim, 2))   # real (even) components
        cols.append(base + jnp.arange(1, head_dim, 2))   # imag (odd) components
    return jnp.concatenate(cols)


def prepare_qkv_weights(wq_t, wk_t, wv_t, *, n_head, n_kv, head_dim):
    """Permute wq/wk output columns head-major, per-head [even half | odd half],
    and fuse q/k/v into a single (D, HQ+2*HKV) weight."""
    wq_p = wq_t[:, _per_head_even_odd_perm(n_head, head_dim)]
    wk_p = wk_t[:, _per_head_even_odd_perm(n_kv, head_dim)]
    return jnp.concatenate([wq_p, wk_p, wv_t], axis=1)


def prepare_rope_tables(cos, sin, *, n_head, n_kv, head_dim):
    """Pretile cos / signed-sin to the q+k slab width; fold 1/sqrt(head_dim)
    into the q columns so the kernel's RoPE is two full-width FMAs."""
    scale = 1.0 / math.sqrt(head_dim)
    cos_head = jnp.concatenate([cos, cos], axis=1)        # (S, hd)
    ss_head = jnp.concatenate([-sin, sin], axis=1)        # (S, hd)
    cos_full = jnp.concatenate(
        [jnp.tile(cos_head, (1, n_head)) * scale, jnp.tile(cos_head, (1, n_kv))],
        axis=1)
    ss_full = jnp.concatenate(
        [jnp.tile(ss_head, (1, n_head)) * scale, jnp.tile(ss_head, (1, n_kv))],
        axis=1)
    return cos_full.astype(jnp.float32), ss_full.astype(jnp.float32)


# -----------------------------------------------------------------------------
# Pure-JAX reference replicating the PyTorch forward exactly (interleaved RoPE)
# -----------------------------------------------------------------------------
def reference_attention(x, wq_t, wk_t, wv_t, wo_t, cos, sin, mask,
                        *, n_head, n_kv, head_dim):
    B, S, D = x.shape
    q = (x @ wq_t).reshape(B, S, n_head, head_dim)
    k = (x @ wk_t).reshape(B, S, n_kv, head_dim)
    v = (x @ wv_t).reshape(B, S, n_kv, head_dim)

    def rope_interleaved(t):
        tr = t.reshape(*t.shape[:-1], head_dim // 2, 2)
        tre, tim = tr[..., 0], tr[..., 1]
        c = cos[None, :, None, :]
        s = sin[None, :, None, :]
        ore = tre * c - tim * s
        oim = tre * s + tim * c
        return jnp.stack([ore, oim], axis=-1).reshape(t.shape)

    q = rope_interleaved(q)
    k = rope_interleaved(k)
    q, k, v = (t.transpose(0, 2, 1, 3) for t in (q, k, v))
    rep = n_head // n_kv
    k = jnp.repeat(k, rep, axis=1)
    v = jnp.repeat(v, rep, axis=1)
    scale = 1.0 / math.sqrt(head_dim)
    s = jnp.einsum('bhqd,bhkd->bhqk', q, k) * scale + mask[None, None]
    p = jax.nn.softmax(s, axis=-1)
    y = jnp.einsum('bhqk,bhkd->bhqd', p, v)
    y = y.transpose(0, 2, 1, 3).reshape(B, S, n_head * head_dim)
    return y @ wo_t


if __name__ == "__main__":
    # Small GQA config consistent with BaseModelArgs semantics.
    B, S = 2, 8
    dim = 32
    n_head = 4
    n_local_heads = 2          # kv heads
    head_dim = dim // n_head   # 8
    rope_base = 10000.0

    key = jax.random.PRNGKey(0)
    kx, kq, kk, kv, ko = jax.random.split(key, 5)
    init = 0.02

    x = jax.random.normal(kx, (B, S, dim), jnp.float32)
    # torch nn.Linear weight is (out, in); kernels use (in, out) = W.T
    wq_t = (init * jax.random.normal(kq, (n_head * head_dim, dim), jnp.float32)).T
    wk_t = (init * jax.random.normal(kk, (n_local_heads * head_dim, dim), jnp.float32)).T
    wv_t = (init * jax.random.normal(kv, (n_local_heads * head_dim, dim), jnp.float32)).T
    wo_t = (init * jax.random.normal(ko, (dim, n_head * head_dim), jnp.float32)).T

    # freqs_cis (complex (S, head_dim//2) in torch) represented as cos/sin.
    inv_freq = 1.0 / (rope_base ** (jnp.arange(0, head_dim, 2, dtype=jnp.float32) / head_dim))
    angles = jnp.arange(S, dtype=jnp.float32)[:, None] * inv_freq[None, :]
    cos = jnp.cos(angles)
    sin = jnp.sin(angles)

    wqkv_t = prepare_qkv_weights(wq_t, wk_t, wv_t, n_head=n_head,
                                 n_kv=n_local_heads, head_dim=head_dim)
    cos_full, ss_full = prepare_rope_tables(cos, sin, n_head=n_head,
                                            n_kv=n_local_heads, head_dim=head_dim)

    # TODO(synk): the kernel generates the causal mask in-kernel; an arbitrary
    # additive attn_mask / kv_cache(input_pos) decode path is not implemented.
    out = attention_pallas(x, wqkv_t, wo_t, cos_full, ss_full,
                           n_head=n_head, n_kv=n_local_heads, head_dim=head_dim)
    out = jax.block_until_ready(out)

    causal = jnp.tril(jnp.ones((S, S), dtype=bool))
    mask = jnp.where(causal, 0.0, -jnp.inf).astype(jnp.float32)
    ref = reference_attention(x, wq_t, wk_t, wv_t, wo_t, cos, sin, mask,
                              n_head=n_head, n_kv=n_local_heads, head_dim=head_dim)

    assert out.shape == (B, S, dim)
    err = jnp.max(jnp.abs(out - ref))
    assert jnp.allclose(out, ref, rtol=1e-4, atol=1e-5), f"max abs err {err}"

    print("KERNEL_OK")
</pallas_src>

<mosaic_0001>
module attributes {stable_mosaic.version = 11 : i64} {
  func.func @_qkv_rope_kernel(%arg0: i32, %arg1: i32, %arg2: i32, %arg3: memref<1x8x32xf32, #tpu.memory_space<vmem>>, %arg4: memref<32x64xf32, #tpu.memory_space<vmem>>, %arg5: memref<8x48xf32, #tpu.memory_space<vmem>>, %arg6: memref<8x48xf32, #tpu.memory_space<vmem>>, %arg7: memref<1x4x8x8xf32, #tpu.memory_space<vmem>>, %arg8: memref<1x2x8x8xf32, #tpu.memory_space<vmem>>, %arg9: memref<1x2x8x8xf32, #tpu.memory_space<vmem>>, %arg10: memref<8x64xf32, #tpu.memory_space<vmem>>) attributes {dimension_semantics = [#tpu.dimension_semantics<parallel>, #tpu.dimension_semantics<parallel>, #tpu.dimension_semantics<arbitrary>], iteration_bounds = array<i64: 2, 1, 1>, scalar_prefetch = 0 : i64, scratch_operands = 1 : i64, tpu.core_type = #tpu.core_type<tc>, window_params = [{transform_indices = @transform_0, window_bounds = array<i64: 1, 8, 32>}, {transform_indices = @transform_1, window_bounds = array<i64: 32, 64>}, {transform_indices = @transform_2, window_bounds = array<i64: 8, 48>}, {transform_indices = @transform_3, window_bounds = array<i64: 8, 48>}, {transform_indices = @transform_4, window_bounds = array<i64: 1, 4, 8, 8>}, {transform_indices = @transform_5, window_bounds = array<i64: 1, 2, 8, 8>}, {transform_indices = @transform_6, window_bounds = array<i64: 1, 2, 8, 8>}]} {
    %c0_i32 = arith.constant 0 : i32
    %0 = arith.cmpi eq, %arg2, %c0_i32 : i32
    %1 = arith.extui %0 : i1 to i32
    %c0_i32_0 = arith.constant 0 : i32
    %2 = arith.cmpi ne, %1, %c0_i32_0 : i32
    scf.if %2 {
      %cst_11 = arith.constant 0.000000e+00 : f32
      %13 = vector.broadcast %cst_11 : f32 to vector<8x64xf32>
      %c0_12 = arith.constant 0 : index
      %c0_13 = arith.constant 0 : index
      %14 = vector.load %arg10[%c0_12, %c0_13] : memref<8x64xf32, #tpu.memory_space<vmem>>, vector<8x64xf32>
      tpu.vector_store %arg10[%c0_12, %c0_13], %13 {strides = array<i32>} : memref<8x64xf32, #tpu.memory_space<vmem>>, vector<8x64xf32>,
    } else {
    }
    %c0 = arith.constant 0 : index
    %c0_1 = arith.constant 0 : index
    %3 = vector.load %arg10[%c0, %c0_1] : memref<8x64xf32, #tpu.memory_space<vmem>>, vector<8x64xf32>
    %c0_2 = arith.constant 0 : index
    %c0_3 = arith.constant 0 : index
    %c0_4 = arith.constant 0 : index
    %4 = vector.load %arg3[%c0_2, %c0_3, %c0_4] : memref<1x8x32xf32, #tpu.memory_space<vmem>>, vector<1x8x32xf32>
    %5 = vector.shape_cast %4 : vector<1x8x32xf32> to vector<8x32xf32>
    %c0_5 = arith.constant 0 : index
    %c0_6 = arith.constant 0 : index
    %6 = vector.load %arg4[%c0_5, %c0_6] : memref<32x64xf32, #tpu.memory_space<vmem>>, vector<32x64xf32>
    %cst = arith.constant dense<0.000000e+00> : vector<8x64xf32>
    %7 = tpu.matmul %5, %6, %cst {dimension_numbers = #tpu.dot_dimension_numbers<[1], [0], [0], [1], [0, 0, 1, 1], [], []>} : vector<8x32xf32>, vector<32x64xf32>, vector<8x64xf32> -> vector<8x64xf32>
    %8 = arith.addf %3, %7 : vector<8x64xf32>
    %c0_7 = arith.constant 0 : index
    %c0_8 = arith.constant 0 : index
    %9 = vector.load %arg10[%c0_7, %c0_8] : memref<8x64xf32, #tpu.memory_space<vmem>>, vector<8x64xf32>
    tpu.vector_store %arg10[%c0_7, %c0_8], %8 {strides = array<i32>} : memref<8x64xf32, #tpu.memory_space<vmem>>, vector<8x64xf32>,
    %c0_i32_9 = arith.constant 0 : i32
    %10 = arith.cmpi eq, %arg2, %c0_i32_9 : i32
    %11 = arith.extui %10 : i1 to i32
    %c0_i32_10 = arith.constant 0 : i32
    %12 = arith.cmpi ne, %11, %c0_i32_10 : i32
    scf.if %12 {
      %c0_11 = arith.constant 0 : index
      %c0_12 = arith.constant 0 : index
      %13 = vector.load %arg10[%c0_11, %c0_12] : memref<8x64xf32, #tpu.memory_space<vmem>>, vector<8x64xf32>
      %14 = vector.extract_strided_slice %13 {offsets = [0, 0], sizes = [8, 48], strides = [1, 1]} : vector<8x64xf32> to vector<8x48xf32>
      %15 = vector.extract_strided_slice %14 {offsets = [0, 44], sizes = [8, 4], strides = [1, 1]} : vector<8x48xf32> to vector<8x4xf32>
      %16 = vector.extract_strided_slice %14 {offsets = [0, 0], sizes = [8, 44], strides = [1, 1]} : vector<8x48xf32> to vector<8x44xf32>
      %17 = tpu.concatenate %15, %16 in 1 : vector<8x4xf32>, vector<8x44xf32> -> vector<8x48xf32>
      %18 = vector.extract_strided_slice %14 {offsets = [0, 4], sizes = [8, 44], strides = [1, 1]} : vector<8x48xf32> to vector<8x44xf32>
      %19 = vector.extract_strided_slice %14 {offsets = [0, 0], sizes = [8, 4], strides = [1, 1]} : vector<8x48xf32> to vector<8x4xf32>
      %20 = tpu.concatenate %18, %19 in 1 : vector<8x44xf32>, vector<8x4xf32> -> vector<8x48xf32>
      %21 = tpu.iota {dimensions = array<i32: 1>} : vector<8x48xi32>
      %c8_i32 = arith.constant 8 : i32
      %c0_i32_13 = arith.constant 0 : i32
      %22 = arith.cmpi eq, %c8_i32, %c0_i32_13 : i32
      %c1_i32 = arith.constant 1 : i32
      %23 = arith.select %22, %c1_i32, %c8_i32 : i32
      %24 = vector.broadcast %23 : i32 to vector<8x48xi32>
      %25 = arith.remsi %21, %24 : vector<8x48xi32>
      %c0_i32_14 = arith.constant 0 : i32
      %26 = vector.broadcast %c0_i32_14 : i32 to vector<8x48xi32>
      %27 = arith.cmpi ne, %25, %26 : vector<8x48xi32>
      %c0_i32_15 = arith.constant 0 : i32
      %28 = vector.broadcast %c0_i32_15 : i32 to vector<8x48xi32>
      %29 = arith.cmpi slt, %25, %28 : vector<8x48xi32>
      %c0_i32_16 = arith.constant 0 : i32
      %30 = arith.cmpi slt, %23, %c0_i32_16 : i32
      %31 = vector.broadcast %30 : i1 to vector<8x48xi1>
      %32 = vector.broadcast %31 : vector<8x48xi1> to vector<8x48xi1>
      %33 = arith.xori %29, %32 : vector<8x48xi1>
      %34 = arith.andi %33, %27 : vector<8x48xi1>
      %35 = vector.broadcast %23 : i32 to vector<8x48xi32>
      %36 = arith.addi %25, %35 : vector<8x48xi32>
      %37 = arith.select %34, %36, %25 : vector<8x48xi1>, vector<8x48xi32>
      %c4_i32 = arith.constant 4 : i32
      %38 = vector.broadcast %c4_i32 : i32 to vector<8x48xi32>
      %39 = arith.cmpi sge, %37, %38 : vector<8x48xi32>
      %40 = arith.select %39, %17, %20 : vector<8x48xi1>, vector<8x48xf32>
      %c0_17 = arith.constant 0 : index
      %c0_18 = arith.constant 0 : index
      %41 = vector.load %arg5[%c0_17, %c0_18] : memref<8x48xf32, #tpu.memory_space<vmem>>, vector<8x48xf32>
      %42 = arith.mulf %14, %41 : vector<8x48xf32>
      %c0_19 = arith.constant 0 : index
      %c0_20 = arith.constant 0 : index
      %43 = vector.load %arg6[%c0_19, %c0_20] : memref<8x48xf32, #tpu.memory_space<vmem>>, vector<8x48xf32>
      %44 = arith.mulf %40, %43 : vector<8x48xf32>
      %45 = arith.addf %42, %44 : vector<8x48xf32>
      %46 = vector.extract_strided_slice %45 {offsets = [0, 0], sizes = [8, 8], strides = [1, 1]} : vector<8x48xf32> to vector<8x8xf32>
      %c0_21 = arith.constant 0 : index
      %c0_22 = arith.constant 0 : index
      %c0_23 = arith.constant 0 : index
      %c0_24 = arith.constant 0 : index
      %47 = vector.load %arg7[%c0_21, %c0_22, %c0_23, %c0_24] : memref<1x4x8x8xf32, #tpu.memory_space<vmem>>, vector<1x1x8x8xf32>
      %48 = vector.shape_cast %47 : vector<1x1x8x8xf32> to vector<8x8xf32>
      %49 = vector.shape_cast %46 : vector<8x8xf32> to vector<1x1x8x8xf32>
      tpu.vector_store %arg7[%c0_21, %c0_22, %c0_23, %c0_24], %49 {strides = array<i32>} : memref<1x4x8x8xf32, #tpu.memory_space<vmem>>, vector<1x1x8x8xf32>,
      %50 = vector.extract_strided_slice %45 {offsets = [0, 8], sizes = [8, 8], strides = [1, 1]} : vector<8x48xf32> to vector<8x8xf32>
      %c0_25 = arith.constant 0 : index
      %c1 = arith.constant 1 : index
      %c0_26 = arith.constant 0 : index
      %c0_27 = arith.constant 0 : index
      %51 = vector.load %arg7[%c0_25, %c1, %c0_26, %c0_27] : memref<1x4x8x8xf32, #tpu.memory_space<vmem>>, vector<1x1x8x8xf32>
      %52 = vector.shape_cast %51 : vector<1x1x8x8xf32> to vector<8x8xf32>
      %53 = vector.shape_cast %50 : vector<8x8xf32> to vector<1x1x8x8xf32>
      tpu.vector_store %arg7[%c0_25, %c1, %c0_26, %c0_27], %53 {strides = array<i32>} : memref<1x4x8x8xf32, #tpu.memory_space<vmem>>, vector<1x1x8x8xf32>,
      %54 = vector.extract_strided_slice %45 {offsets = [0, 16], sizes = [8, 8], strides = [1, 1]} : vector<8x48xf32> to vector<8x8xf32>
      %c0_28 = arith.constant 0 : index
      %c2 = arith.constant 2 : index
      %c0_29 = arith.constant 0 : index
      %c0_30 = arith.constant 0 : index
      %55 = vector.load %arg7[%c0_28, %c2, %c0_29, %c0_30] : memref<1x4x8x8xf32, #tpu.memory_space<vmem>>, vector<1x1x8x8xf32>
      %56 = vector.shape_cast %55 : vector<1x1x8x8xf32> to vector<8x8xf32>
      %57 = vector.shape_cast %54 : vector<8x8xf32> to vector<1x1x8x8xf32>
      tpu.vector_store %arg7[%c0_28, %c2, %c0_29, %c0_30], %57 {strides = array<i32>} : memref<1x4x8x8xf32, #tpu.memory_space<vmem>>, vector<1x1x8x8xf32>,
      %58 = vector.extract_strided_slice %45 {offsets = [0, 24], sizes = [8, 8], strides = [1, 1]} : vector<8x48xf32> to vector<8x8xf32>
      %c0_31 = arith.constant 0 : index
      %c3 = arith.constant 3 : index
      %c0_32 = arith.constant 0 : index
      %c0_33 = arith.constant 0 : index
      %59 = vector.load %arg7[%c0_31, %c3, %c0_32, %c0_33] : memref<1x4x8x8xf32, #tpu.memory_space<vmem>>, vector<1x1x8x8xf32>
      %60 = vector.shape_cast %59 : vector<1x1x8x8xf32> to vector<8x8xf32>
      %61 = vector.shape_cast %58 : vector<8x8xf32> to vector<1x1x8x8xf32>
      tpu.vector_store %arg7[%c0_31, %c3, %c0_32, %c0_33], %61 {strides = array<i32>} : memref<1x4x8x8xf32, #tpu.memory_space<vmem>>, vector<1x1x8x8xf32>,
      %62 = vector.extract_strided_slice %45 {offsets = [0, 32], sizes = [8, 8], strides = [1, 1]} : vector<8x48xf32> to vector<8x8xf32>
      %c0_34 = arith.constant 0 : index
      %c0_35 = arith.constant 0 : index
      %c0_36 = arith.constant 0 : index
      %c0_37 = arith.constant 0 : index
      %63 = vector.load %arg8[%c0_34, %c0_35, %c0_36, %c0_37] : memref<1x2x8x8xf32, #tpu.memory_space<vmem>>, vector<1x1x8x8xf32>
      %64 = vector.shape_cast %63 : vector<1x1x8x8xf32> to vector<8x8xf32>
      %65 = vector.shape_cast %62 : vector<8x8xf32> to vector<1x1x8x8xf32>
      tpu.vector_store %arg8[%c0_34, %c0_35, %c0_36, %c0_37], %65 {strides = array<i32>} : memref<1x2x8x8xf32, #tpu.memory_space<vmem>>, vector<1x1x8x8xf32>,
      %66 = vector.extract_strided_slice %13 {offsets = [0, 48], sizes = [8, 8], strides = [1, 1]} : vector<8x64xf32> to vector<8x8xf32>
      %c0_38 = arith.constant 0 : index
      %c0_39 = arith.constant 0 : index
      %c0_40 = arith.constant 0 : index
      %c0_41 = arith.constant 0 : index
      %67 = vector.load %arg9[%c0_38, %c0_39, %c0_40, %c0_41] : memref<1x2x8x8xf32, #tpu.memory_space<vmem>>, vector<1x1x8x8xf32>
      %68 = vector.shape_cast %67 : vector<1x1x8x8xf32> to vector<8x8xf32>
      %69 = vector.shape_cast %66 : vector<8x8xf32> to vector<1x1x8x8xf32>
      tpu.vector_store %arg9[%c0_38, %c0_39, %c0_40, %c0_41], %69 {strides = array<i32>} : memref<1x2x8x8xf32, #tpu.memory_space<vmem>>, vector<1x1x8x8xf32>,
      %70 = vector.extract_strided_slice %45 {offsets = [0, 40], sizes = [8, 8], strides = [1, 1]} : vector<8x48xf32> to vector<8x8xf32>
      %c0_42 = arith.constant 0 : index
      %c1_43 = arith.constant 1 : index
      %c0_44 = arith.constant 0 : index
      %c0_45 = arith.constant 0 : index
      %71 = vector.load %arg8[%c0_42, %c1_43, %c0_44, %c0_45] : memref<1x2x8x8xf32, #tpu.memory_space<vmem>>, vector<1x1x8x8xf32>
      %72 = vector.shape_cast %71 : vector<1x1x8x8xf32> to vector<8x8xf32>
      %73 = vector.shape_cast %70 : vector<8x8xf32> to vector<1x1x8x8xf32>
      tpu.vector_store %arg8[%c0_42, %c1_43, %c0_44, %c0_45], %73 {strides = array<i32>} : memref<1x2x8x8xf32, #tpu.memory_space<vmem>>, vector<1x1x8x8xf32>,
      %74 = vector.extract_strided_slice %13 {offsets = [0, 56], sizes = [8, 8], strides = [1, 1]} : vector<8x64xf32> to vector<8x8xf32>
      %c0_46 = arith.constant 0 : index
      %c1_47 = arith.constant 1 : index
      %c0_48 = arith.constant 0 : index
      %c0_49 = arith.constant 0 : index
      %75 = vector.load %arg9[%c0_46, %c1_47, %c0_48, %c0_49] : memref<1x2x8x8xf32, #tpu.memory_space<vmem>>, vector<1x1x8x8xf32>
      %76 = vector.shape_cast %75 : vector<1x1x8x8xf32> to vector<8x8xf32>
      %77 = vector.shape_cast %74 : vector<8x8xf32> to vector<1x1x8x8xf32>
      tpu.vector_store %arg9[%c0_46, %c1_47, %c0_48, %c0_49], %77 {strides = array<i32>} : memref<1x2x8x8xf32, #tpu.memory_space<vmem>>, vector<1x1x8x8xf32>,
    } else {
    }
    return
  }
  func.func @transform_0(%arg0: i32, %arg1: i32, %arg2: i32) -> (i32, i32, i32) {
    %c0_i32 = arith.constant 0 : i32
    return %arg0, %arg1, %arg2 : i32, i32, i32
  }
  func.func @transform_1(%arg0: i32, %arg1: i32, %arg2: i32) -> (i32, i32) {
    %c0_i32 = arith.constant 0 : i32
    %c0_i32_0 = arith.constant 0 : i32
    return %arg2, %c0_i32 : i32, i32
  }
  func.func @transform_2(%arg0: i32, %arg1: i32, %arg2: i32) -> (i32, i32) {
    %c0_i32 = arith.constant 0 : i32
    %c0_i32_0 = arith.constant 0 : i32
    return %arg1, %c0_i32 : i32, i32
  }
  func.func @transform_3(%arg0: i32, %arg1: i32, %arg2: i32) -> (i32, i32) {
    %c0_i32 = arith.constant 0 : i32
    %c0_i32_0 = arith.constant 0 : i32
    return %arg1, %c0_i32 : i32, i32
  }
  func.func @transform_4(%arg0: i32, %arg1: i32, %arg2: i32) -> (i32, i32, i32, i32) {
    %c0_i32 = arith.constant 0 : i32
    %c0_i32_0 = arith.constant 0 : i32
    %c0_i32_1 = arith.constant 0 : i32
    return %arg0, %c0_i32, %arg1, %c0_i32_0 : i32, i32, i32, i32
  }
  func.func @transform_5(%arg0: i32, %arg1: i32, %arg2: i32) -> (i32, i32, i32, i32) {
    %c0_i32 = arith.constant 0 : i32
    %c0_i32_0 = arith.constant 0 : i32
    %c0_i32_1 = arith.constant 0 : i32
    return %arg0, %c0_i32, %arg1, %c0_i32_0 : i32, i32, i32, i32
  }
  func.func @transform_6(%arg0: i32, %arg1: i32, %arg2: i32) -> (i32, i32, i32, i32) {
    %c0_i32 = arith.constant 0 : i32
    %c0_i32_0 = arith.constant 0 : i32
    %c0_i32_1 = arith.constant 0 : i32
    return %arg0, %c0_i32, %arg1, %c0_i32_0 : i32, i32, i32, i32
  }
}

</mosaic_0001>

<bundles_post_ra>
// kernel: tpu_custom_call.1
= control target key start
LH: loop header
LB: loop body
LE: loop exit
PB: predicated region body
PF: predicated region fallthrough
CT: control target
= control target key end

     0   :  { %12 = vsyncpa [#allocation4], 0  ;;  %s1615_s0 = inlined_call_operand.hbm [shape: f32[2,8,32], index: 0, kind: input, shape index: {}]   ;;  %s1616_s1 = inlined_call_operand.hbm [shape: f32[32,64], index: 1, kind: input, shape index: {}]   ;;  %s1617_s2 = inlined_call_operand.hbm [shape: f32[8,48], index: 2, kind: input, shape index: {}]   ;;  %s1618_s3 = inlined_call_operand.vmem [shape: f32[8,48], index: 3, kind: input, shape index: {}]   ;;  %s1619_s4 = inlined_call_operand.hbm [shape: f32[2,4,8,8], index: 4, kind: output, shape index: {0}]   ;;  %s1620_s5 = inlined_call_operand.hbm [shape: f32[2,2,8,8], index: 5, kind: output, shape index: {1}]   ;;  %s1621_s6 = inlined_call_operand.hbm [shape: f32[2,2,8,8], index: 6, kind: output, shape index: {2}]  }
   0x1   :  { %14 = vsyncpa [#allocation4 + $0x1], 0 }
   0x2   :  { %15 = vsyncpa [#allocation7], 0 }
   0x3   :  { %16 = vsyncpa [#allocation5], 0 }
   0x4   :  { %18 = vsyncpa [#allocation5 + $0x1], 0 }
   0x5   :  { %19 = vsyncpa [#allocation11], 0 }
   0x6   :  { %21 = vsyncpa [#allocation11 + $0x1], 0  ;;  %s1255_s21 = smov 0   ;;  %s1257_s22 = smov 0  }
   0x7   :  { %s1259_s23 = smov 0   ;;  %s1261_s24 = smov 0  }
   0x8   :  { %s1263_s25 = smov 0   ;;  %s1265_s26 = smov 0  }
   0x9 LB: > { %s1286_s27 = sadd.s32 4294967295, %s1194_s26   ;;  %s1623_s28 = sadd.s32 4294967294, %s1194_s26   ;;  %s1194_s26 = sphi %s1265_s26, %s27_s26   ;;  %s1190_s25 = sphi %s1263_s25, %s1651_s25   ;;  %s1186_s24 = sphi %s1261_s24, %s1650_s24   ;;  %s1182_s23 = sphi %s1259_s23, %s1649_s23   ;;  %s1178_s22 = sphi %s1257_s22, %s1648_s22   ;;  %s1174_s21 = sphi %s1255_s21, %s1647_s21  }
   0xa   : > { %p70_p0 = scmp.ne.s32.totalorder %s1178_s22, %s1174_s21  ;;  %p1622_p1 = scmp.eq.s32.totalorder %s1286_s27, 0 }
   0xb   : > { %p180_p3 = scmp.eq.s32.totalorder %s1623_s28, 1  ;;  %p795_p5 = scmp.ge.s32.totalorder %s1194_s26, 1 }
   0xc   : > { %p1297_p4 = por %p1622_p1, %p70_p0  ;;  %p243_p7 = scmp.lt.s32.totalorder %s1194_s26, 3 }
   0xd   : > { %p1302_p6 = por %p180_p3, %p70_p0  ;;  %s1196_s8 = smov [#allocation6]  }
   0xe   : > { %s1629_s29 = scalar_select %p1297_p4, 1, 0 }
   0xf   : > { %s1630_s30 = scalar_select %p1302_p6, 1, 0 }
  0x10   : > { %p1307_p8 = pnand %p795_p5, %p243_p7  ;;  %s258_s9 = sshll.u32 %s1196_s8, 4  ;;  %s1311_s9 = int_to_ptr.vmem [resolvable:$true] %s258_s9 }
  0x11   : > { %s1197_s11 = smov [#allocation8]   ;;  %s962_s15 = scalar_lea.hbm %s1616_s1, 512 }
  0x12   : > { %p867_p9 = pneg %p1307_p8  ;;  %s274_s12 = sshll.u32 %s1197_s11, 4  ;;  %s1322_s12 = int_to_ptr.vmem [resolvable:$true] %s274_s12 }
  0x13   : > { %p963_p12 = scmp.ne.s32.totalorder %s1616_s1, %s962_s15  ;;  %p969_p5 = scmp.lt.u32.totalorder %s962_s15, %s1616_s1 }
  0x14   : > { %p1318_p11 = pnand %p867_p9, %p1622_p1 }
  0x16   : > { %p964_p13 = pneg %p1318_p11 }
  0x18   : > { %p965_p0 = pnand %p964_p13, %p963_p12 }
  0x1a   : > { %p966_p3 = pneg %p965_p0 }
  0x1c   : > { %p971_p7 = pnand %p969_p5, %p966_p3 }
  0x1e   : > { %974 = shalt.err (!%p971_p7)
}
  0x1f   : > { %s975_s20 = scalar_lea.vmem %s1311_s9, 512  ;;  %p983_p2 = scmp.lt.s32.totalorder %s1311_s9, %s1311_s9 }
  0x20   : > { %p976_p9 = scmp.ne.s32.totalorder %s1311_s9, %s975_s20  ;;  %p984_p12 = scmp.lt.s32.totalorder %s975_s20, %s975_s20 }
  0x22   : > { %p978_p10 = pnand %p976_p9, %p964_p13  ;;  %p985_p0 = por %p984_p12, %p983_p2 }
  0x24   : > { %p979_p1 = pneg %p978_p10 }
  0x26   : > { %p986_p6 = pnand %p985_p0, %p979_p1 }
  0x28   : > { %989 = shalt.err (!%p986_p6)
}
  0x29   : > { %s1198_s8 = smov 128   ;;  %s1199_s11 = smov 8  }
  0x2a   : > { %870 = dma.hbm_to_vmem [thread:$0]  (!%p1318_p11), %s1616_s1, 512, %s1311_s9, [#allocation7], %s1198_s8, %s1198_s8, %s1199_s11  }
  0x2b   : > { %s990_s17 = scalar_lea.hbm %s1617_s2, 128 }
  0x2c   : > { %p991_p2 = scmp.ne.s32.totalorder %s1617_s2, %s990_s17  ;;  %p997_p10 = scmp.lt.u32.totalorder %s990_s17, %s1617_s2 }
  0x2e   : > { %p993_p1 = pnand %p991_p2, %p964_p13 }
  0x30   : > { %p994_p6 = pneg %p993_p1 }
  0x32   : > { %p999_p3 = pnand %p997_p10, %p994_p6 }
  0x34   : > { %1002 = shalt.err (!%p999_p3)
}
  0x35   : > { %s1003_s9 = scalar_lea.vmem %s1322_s12, 128  ;;  %p1011_p12 = scmp.lt.s32.totalorder %s1322_s12, %s1322_s12 }
  0x36   : > { %p1004_p5 = scmp.ne.s32.totalorder %s1322_s12, %s1003_s9  ;;  %p1012_p0 = scmp.lt.s32.totalorder %s1003_s9, %s1003_s9 }
  0x38   : > { %p1006_p7 = pnand %p1004_p5, %p964_p13  ;;  %p1013_p2 = por %p1012_p0, %p1011_p12 }
  0x3a   : > { %p1007_p9 = pneg %p1006_p7 }
  0x3c   : > { %p1014_p1 = pnand %p1013_p2, %p1007_p9 }
  0x3e   : > { %1017 = shalt.err (!%p1014_p1)
}
  0x3f   : > { %873 = dma.hbm_to_vmem [thread:$0]  (!%p1318_p11), %s1617_s2, 128, %s1322_s12, [#allocation7]  }
  0x40   : > { %s46_s11 = sadd.s32 1, %s1190_s25  ;;  %s57_s13 = sadd.s32 1, %s1182_s23 }
  0x41   : > { %p48_p13 = scmp.ge.s32.totalorder %s46_s11, 2  ;;  %p64_p6 = scmp.ne.s32.totalorder %s1182_s23, %s1178_s22 }
  0x42   : > { %p65_p10 = scmp.eq.s32.totalorder %s1194_s26, 0  ;;  %p890_p3 = scmp.lt.s32.totalorder %s1194_s26, 2 }
  0x43   : > { %s1653_s11 = smov (%p48_p13, %s46_s11), 0  ;;  %p1633_p7 = scmp.eq.s32.totalorder %s1286_s27, 1 }
  0x44   : > { %p66_p5 = por %p65_p10, %p64_p6  ;;  %s50_s14 = ssub.s32 %s1190_s25, %s1653_s11 }
  0x45   : > { %p1386_p9 = por %p1633_p7, %p64_p6  ;;  %s292_s15 = sand.u32 1, %s1182_s23  }
  0x46   : > { %p55_p12 = scmp.eq.s32.totalorder %s50_s14, 0  ;;  %s800_s12 = sshll.u32 %s292_s15, 3 }
  0x47   : > { %s1634_s10 = scalar_select %p1386_p9, 1, 0 }
  0x48   : > { %s801_s16 = sshll.u32 %s1190_s25, 7  ;;  %s296_s9 = scalar_lea.vmem [#allocation3], %s800_s12 }
  0x49   : > { %s1395_s17 = scalar_select %p55_p12, %s1182_s23, %s57_s13  }
  0x4a   : > { %s1400_s20 = scalar_lea.hbm %s1615_s0, %s801_s16  ;;  %s305_s28 = sshll.u32 %s296_s9, 4  ;;  %s1408_s28 = int_to_ptr.vmem [resolvable:$true] %s305_s28 }
  0x4b   : > { %p1404_p11 = pnand %p890_p3, %p66_p5  ;;  %s293_s13 = scalar_lea.sflag [#allocation4], %s292_s15 }
  0x4c   : > { %s1018_s14 = scalar_lea.hbm %s1400_s20, 128  ;;  %s1023_s18 = scalar_lea.hbm %s1615_s0, 256 }
  0x4d   : > { %p1019_p0 = scmp.ne.s32.totalorder %s1400_s20, %s1018_s14  ;;  %p1020_p2 = pneg %p1404_p11 }
  0x4e   : > { %p1024_p6 = scmp.lt.u32.totalorder %s1400_s20, %s1615_s0  ;;  %p1025_p10 = scmp.lt.u32.totalorder %s1023_s18, %s1018_s14 }
  0x4f   : > { %p1021_p1 = pnand %p1020_p2, %p1019_p0  ;;  %p1027_p5 = scmp.lt.u32.totalorder %s1018_s14, %s1400_s20 }
  0x50   : > { %p1026_p3 = por %p1025_p10, %p1024_p6 }
  0x51   : > { %p1022_p13 = pneg %p1021_p1 }
  0x52   : > { %p1028_p7 = por %p1027_p5, %p1026_p3 }
  0x54   : > { %p1029_p12 = pnand %p1028_p7, %p1022_p13 }
  0x56   : > { %1032 = shalt.err (!%p1029_p12)
}
  0x57   : > { %s1033_s15 = scalar_lea.vmem %s1408_s28, 128  ;;  %s1200_s12 = smov [#allocation3]  }
  0x58   : > { %p1034_p0 = scmp.ne.s32.totalorder %s1408_s28, %s1033_s15  ;;  %s1038_s16 = sshll.u32 %s1200_s12, 4  ;;  %s1039_s16 = int_to_ptr.vmem [resolvable:$false] %s1038_s16 }
  0x59   : > { %s1040_s19 = scalar_lea.vmem %s1039_s16, 256  ;;  %p1041_p4 = scmp.lt.s32.totalorder %s1408_s28, %s1039_s16 }
  0x5a   : > { %p1036_p1 = pnand %p1034_p0, %p1020_p2  ;;  %p1042_p6 = scmp.lt.s32.totalorder %s1040_s19, %s1033_s15 }
  0x5c   : > { %p1037_p9 = pneg %p1036_p1  ;;  %p1043_p10 = por %p1042_p6, %p1041_p4 }
  0x5e   : > { %p1044_p3 = pnand %p1043_p10, %p1037_p9 }
  0x60   : > { %1047 = shalt.err (!%p1044_p3)
}
  0x61   : > { %877 = dma.hbm_to_vmem [thread:$0]  (!%p1404_p11), %s1400_s20, 128, %s1408_s28, %s293_s13  }
  0x62   : > { %314 = sbr.rel (%p1307_p8) target bundleno = 645 (0x285), region = 36  ;;  %s1438_s14 = sand.u32 (!%p1307_p8), 1, %s1178_s22  }
  0x63   : > { %s803_s18 = sshll.u32 (!%p1307_p8), %s1438_s14, 3  ;;  %s317_s9 = scalar_lea.sflag (!%p1307_p8), [#allocation4], %s1438_s14 }
  0x64   : > { %s320_s15 = scalar_lea.vmem (!%p1307_p8), [#allocation3], %s803_s18  ;;  %p1636_p4 = scmp.ne.s32.totalorder (!%p1307_p8), %s1629_s29, 0 }
  0x69   : > { %1157 = dma.done.wait (%p1636_p4), %s317_s9, 128  }
  0x6a   : > { %1159 = vsyncadd (%p1636_p4), %s317_s9, 4294967168  ;;  %p1637_p9 = scmp.eq.s32.totalorder %s1286_s27, 0 }
  0x6c   : > { %1161 = dma.done.wait (%p1637_p9), [#allocation7], 640   ;;  %p1638_p11 = pmov %p1637_p9 }
  0x6d   : > { %vm380_vm0 = vcmask 523264   ;;  %v1201_v0 = vmov 0.0|0.0   ;;  %v1202_v1 = vmov 0.0   ;;  %vm1203_vm1 = vmmov 0   ;;  %v384_v2 = vld [vmem:[#allocation6] sm:$0xff]  ;;  %v385_v3 = vld [vmem:[#allocation6 + $0x8] sm:$0xff] }
  0x6e   : > { %1163 = vsyncadd (%p1638_p11), [#allocation7], 4294966656  ;;  %845 = vmatprep.subr.bf16.mxu0 %v1201_v0  ;;  %381 = vst.msk [vmem:[#allocation2] sm:$0xff] %vm380_vm0, %v1202_v1  ;;  %842 = vmatprep.mubr.msk.f32.mxu0 %vm1203_vm1, %v1202_v1  ;;  %v386_v4 = vld [vmem:[#allocation6 + $0x10] sm:$0xff]  ;;  %v846_v5 = vpack.c.bf16 %v385_v3, %v384_v2  ;;  %v387_v6 = vld [vmem:[#allocation6 + $0x18] sm:$0xff]  ;;  %vm388_vm2 = vcmask 261120   ;;  %v486_v14 = vlaneseq }
  0x6f   : > { %v849_v7 = vpack.c.bf16 %v387_v6, %v386_v4  ;;  %v383_v8 = vld [vmem:[%s320_s15] sm:$0xff]  ;;  %s1204_s29 = smov 124   ;;  %s1205_s7 = smov 84   ;;  %vm484_vm3 = vcmask 359424   ;;  %vm476_vm4 = vcmask 31744   ;;  %v502_v20 = vld [vmem:[#allocation8] sm:$0xff] }
  0x70   : > { %847 = vmatpush3.bf16.msra.mxu0 %v846_v5  ;;  %s1206_s20 = smov 44   ;;  %s1207_s28 = smov 4   ;;  %v487_v15 = vand.u32 127, %v486_v14  ;;  %v504_v21 = vld [vmem:[%s1618_s3] sm:$0xff]  ;;  %vm507_vm6 = vcmask 64512  }
  0x71   : > { %848 = vmatprep.subr.bf16.mxu0 %v1201_v0  ;;  %s806_s12 = sshll.u32 %s1438_s14, 5  ;;  %s1208_s16 = smov 88  }
  0x72   : > { %v492_v16 = vand.u32 7, %v487_v15  ;;  %s1209_s19 = smov 96   ;;  %s1456_s18 = scalar_lea.vmem [#allocation9], %s806_s12 }
  0x73   : > { %s1210_s9 = smov 112   ;;  %s1211_s15 = smov 120  }
  0x74   : > { %850 = vmatpush3.bf16.msra.mxu0 %v849_v7  ;;  %vm500_vm5 = vcmp.ge.s32.totalorder %v492_v16, 4  ;;  %s548_s12 = sand.u32 1, %s1286_s27   ;;  %p1639_p2 = scmp.ne.s32.totalorder %s1634_s10, 0 }
  0x75   : > { %v382_v9 = vld [vmem:[#allocation2] sm:$0xff] }
  0x77   : > { %843 = vmatmul.mubr.msk.f32.vlgmr.msra.gmra.mrb[0].mxu0 %vm388_vm2, %v383_v8 }
 0x14a   : > { %v458_v10 = vpop.f32.mrb[0].mxu0 }
 0x14b   : > { %v462_v11 = vadd.f32 %v458_v10, %v382_v9  ;;  %v844_v12 = vpop.f32.mrb[1].mxu0 }
 0x14d   : > { %464 = vst.msk [vmem:[#allocation2] sm:$0xff] %vm380_vm0, %v462_v11 }
 0x154   : > { %v468_v13 = vld [vmem:[#allocation2] sm:$0xff] }
 0x155   : > { %478 = vrot.lane.b32.xlu1 %v468_v13, %s1204_s29  ;;  %470 = vrot.lane.b32.xlu0 %v468_v13, %s1205_s7  ;;  %v503_v26 = vmul.f32 %v502_v20, %v468_v13  ;;  %s1212_s29 = smov 80   ;;  %s1213_s7 = smov 104  }
 0x159   : > { %481 = vrot.lane.b32.xlu1 %v468_v13, %s1206_s20  ;;  %473 = vrot.lane.b32.xlu0 %v468_v13, %s1207_s28  ;;  %s1214_s20 = smov 72   ;;  %s807_s28 = sshll.u32 %s1438_s14, 4 }
 0x15a   : > { %s363_s8 = scalar_lea.vmem [#allocation10], %s807_s28 }
 0x15b   : > { %s585_s13 = sshll.u32 %s363_s8, 4  ;;  %s1465_s13 = int_to_ptr.vmem [resolvable:$true] %s585_s13 }
 0x15c   : > { %s1048_s27 = scalar_lea.vmem %s1465_s13, 256 }
 0x15d   : > { %p1049_p8 = scmp.ne.s32.totalorder %s1465_s13, %s1048_s27 }
 0x15f   : > { %p1050_p13 = pnand %p1049_p8, %p1639_p2 }
 0x161   : > { %p1051_p5 = pneg %p1050_p13 }
 0x1c7   : > { %v479_v17 = vpop.permute.xlu1 %478  ;;  %v471_v18 = vpop.permute.xlu0 %470 }
 0x1cb   : > { %v482_v19 = vpop.permute.xlu1 %481  ;;  %v474_v22 = vpop.permute.xlu0 %473 }
 0x1cc   : > { %v485_v23 = vsel %vm484_vm3, %v479_v17, %v482_v19  ;;  %v477_v24 = vsel %vm476_vm4, %v471_v18, %v474_v22 }
 0x1cd   : > { %v501_v25 = vsel %vm500_vm5, %v477_v24, %v485_v23 }
 0x1ce   : > { %v505_v27 = vmul.f32 %v504_v21, %v501_v25 }
 0x1d0   : > { %v506_v28 = vadd.f32 %v505_v27, %v503_v26 }
 0x1d2   : > { %533 = vrot.lane.b32.xlu1 %v506_v28, %s1208_s16  ;;  %525 = vrot.lane.b32.xlu0 %v506_v28, %s1209_s19  ;;  %508 = vst.msk [vmem:[%s1456_s18] sm:$0xff] %vm507_vm6, %v506_v28  ;;  %s1626_s16 = sshll.u32 %s1186_s24, 8 }
 0x1d6   : > { %515 = vrot.lane.b32.xlu1 %v506_v28, %s1210_s9  ;;  %510 = vrot.lane.b32.xlu0 %v506_v28, %s1211_s15  ;;  %s1472_s15 = scalar_lea.hbm %s1620_s5, %s1626_s16 }
 0x1da   : > { %529 = vrot.lane.b32.xlu1 %v468_v13, %s1212_s29  ;;  %520 = vrot.lane.b32.xlu0 %v506_v28, %s1213_s7  ;;  %s1476_s29 = scalar_lea.sflag [#allocation11], %s548_s12  ;;  %s1215_s7 = smov [#allocation10]  }
 0x1de   : > { %538 = vrot.lane.b32.xlu0 %v468_v13, %s1214_s20  ;;  %s1052_s20 = sshll.u32 %s1215_s7, 4  ;;  %s1053_s20 = int_to_ptr.vmem [resolvable:$false] %s1052_s20 }
 0x1df   : > { %s1054_s19 = scalar_lea.vmem %s1053_s20, 512  ;;  %p1055_p7 = scmp.lt.s32.totalorder %s1465_s13, %s1053_s20 }
 0x1e0   : > { %p1056_p12 = scmp.lt.s32.totalorder %s1054_s19, %s1048_s27 }
 0x1e2   : > { %p1057_p0 = por %p1056_p12, %p1055_p7 }
 0x1e4   : > { %p1058_p1 = pnand %p1057_p0, %p1051_p5 }
 0x244   : > { %v534_v29 = vpop.permute.xlu1 %533  ;;  %v526_v30 = vpop.permute.xlu0 %525 }
 0x245   : > { %813 = vst.msk [vmem:[%s363_s8 + $0x8] sm:$0xff] %vm507_vm6, %v534_v29  ;;  %528 = vst.msk [vmem:[%s363_s8] sm:$0xff] %vm507_vm6, %v526_v30 }
 0x246   : > { %1061 = shalt.err (!%p1058_p1)
}
 0x247   : > { %s1062_s8 = scalar_lea.hbm %s1472_s15, 256  ;;  %s1066_s7 = scalar_lea.hbm %s1620_s5, 512 }
 0x248   : > { %p1063_p6 = scmp.ne.s32.totalorder %s1472_s15, %s1062_s8  ;;  %p1067_p4 = scmp.lt.u32.totalorder %s1472_s15, %s1620_s5 }
 0x249   : > { %p1068_p9 = scmp.lt.u32.totalorder %s1066_s7, %s1062_s8  ;;  %p1070_p8 = scmp.lt.u32.totalorder %s1062_s8, %s1472_s15 }
 0x24a   : > { %p1064_p10 = pnand %p1063_p6, %p1639_p2 }
 0x24b   : > { %p1069_p11 = por %p1068_p9, %p1067_p4 }
 0x24c   : > { %p1065_p3 = pneg %p1064_p10 }
 0x24d   : > { %p1071_p13 = por %p1070_p8, %p1069_p11 }
 0x24f   : > { %p1072_p5 = pnand %p1071_p13, %p1065_p3 }
 0x251   : > { %1075 = shalt.err (!%p1072_p5)
}
 0x252   : > { %s1627_s27 = smov 128   ;;  %s1217_s19 = smov 8   ;;  %v516_v31 = vpop.permute.xlu1 %515  ;;  %v511_v32 = vpop.permute.xlu0 %510 }
 0x253   : > { %862 = dma.vmem_to_hbm [thread:$0]  (%p1639_p2), %s1465_s13, 256, %s1472_s15, %s1476_s29, %s1627_s27, %s1627_s27, %s1217_s19  }
 0x254   : > { %s568_s16 = sshll.u32 %s1456_s18, 4  ;;  %s826_s8 = sshll.u32 %s1186_s24, 9  ;;  %811 = vst.msk [vmem:[%s1456_s18 + $0x10] sm:$0xff] %vm507_vm6, %v516_v31  ;;  %810 = vst.msk [vmem:[%s1456_s18 + $0x8] sm:$0xff] %vm507_vm6, %v511_v32  ;;  %s1509_s16 = int_to_ptr.vmem [resolvable:$true] %s568_s16 }
 0x255   : > { %s1514_s7 = scalar_lea.hbm %s1619_s4, %s826_s8  ;;  %s1518_s13 = scalar_lea.vmem [#allocation12], %s807_s28 }
 0x256   : > { %v530_v33 = vpop.permute.xlu1 %529  ;;  %v521_v34 = vpop.permute.xlu0 %520  ;;  %s1076_s27 = scalar_lea.vmem %s1509_s16, 512  ;;  %s1218_s8 = smov [#allocation9]  }
 0x257   : > { %532 = vst.msk [vmem:[%s1518_s13] sm:$0xff] %vm507_vm6, %v530_v33  ;;  %812 = vst.msk [vmem:[%s1456_s18 + $0x18] sm:$0xff] %vm507_vm6, %v521_v34  ;;  %p1077_p7 = scmp.ne.s32.totalorder %s1509_s16, %s1076_s27  ;;  %s1080_s12 = sshll.u32 %s1218_s8, 4  ;;  %s1081_s12 = int_to_ptr.vmem [resolvable:$false] %s1080_s12 }
 0x258   : > { %s1082_s28 = scalar_lea.vmem %s1081_s12, 1024  ;;  %p1083_p1 = scmp.lt.s32.totalorder %s1509_s16, %s1081_s12 }
 0x259   : > { %p1078_p12 = pnand %p1077_p7, %p1639_p2  ;;  %p1084_p6 = scmp.lt.s32.totalorder %s1082_s28, %s1076_s27 }
 0x25b   : > { %p1079_p0 = pneg %p1078_p12  ;;  %p1085_p10 = por %p1084_p6, %p1083_p1 }
 0x25d   : > { %p1086_p3 = pnand %p1085_p10, %p1079_p0 }
 0x25f   : > { %1089 = shalt.err (!%p1086_p3)
}
 0x260   : > { %s1090_s18 = scalar_lea.hbm %s1514_s7, 512  ;;  %s1094_s8 = scalar_lea.hbm %s1619_s4, 1024 }
 0x261   : > { %p1091_p4 = scmp.ne.s32.totalorder %s1514_s7, %s1090_s18  ;;  %p1095_p8 = scmp.lt.u32.totalorder %s1514_s7, %s1619_s4 }
 0x262   : > { %p1096_p13 = scmp.lt.u32.totalorder %s1094_s8, %s1090_s18  ;;  %p1098_p7 = scmp.lt.u32.totalorder %s1090_s18, %s1514_s7 }
 0x263   : > { %p1092_p9 = pnand %p1091_p4, %p1639_p2 }
 0x264   : > { %p1097_p5 = por %p1096_p13, %p1095_p8 }
 0x265   : > { %p1093_p11 = pneg %p1092_p9 }
 0x266   : > { %p1099_p12 = por %p1098_p7, %p1097_p5 }
 0x268   : > { %p1100_p0 = pnand %p1099_p12, %p1093_p11 }
 0x26a   : > { %1103 = shalt.err (!%p1100_p0)
}
 0x26b   : > { %s1640_s27 = smov 128   ;;  %s1641_s28 = scalar_lea.sflag [#allocation5], %s1438_s14  ;;  %v539_v35 = vpop.permute.xlu0 %538 }
 0x26c   : > { %861 = dma.vmem_to_hbm [thread:$0]  (%p1639_p2), %s1509_s16, 512, %s1514_s7, %s1641_s28, %s1640_s27, %s1640_s27, %s1217_s19  }
 0x26d   : > { %s1642_s15 = sshll.u32 %s1518_s13, 4  ;;  %s1643_s20 = sshll.u32 %s1186_s24, 8  ;;  %814 = vst.msk [vmem:[%s1518_s13 + $0x8] sm:$0xff] %vm507_vm6, %v539_v35  ;;  %s1554_s15 = int_to_ptr.vmem [resolvable:$true] %s1642_s15 }
 0x26e   : > { %s1561_s8 = scalar_lea.hbm %s1621_s6, %s1643_s20  ;;  %s1104_s14 = scalar_lea.vmem %s1554_s15, 256 }
 0x26f   : > { %p1105_p1 = scmp.ne.s32.totalorder %s1554_s15, %s1104_s14  ;;  %s1219_s16 = smov [#allocation12]  }
 0x270   : > { %s1108_s7 = sshll.u32 %s1219_s16, 4  ;;  %s1109_s7 = int_to_ptr.vmem [resolvable:$false] %s1108_s7 }
 0x271   : > { %p1106_p6 = pnand %p1105_p1, %p1639_p2  ;;  %s1110_s24 = scalar_lea.vmem %s1109_s7, 512 }
 0x272   : > { %p1111_p3 = scmp.lt.s32.totalorder %s1554_s15, %s1109_s7  ;;  %p1112_p4 = scmp.lt.s32.totalorder %s1110_s24, %s1104_s14 }
 0x273   : > { %p1107_p10 = pneg %p1106_p6 }
 0x274   : > { %p1113_p9 = por %p1112_p4, %p1111_p3 }
 0x276   : > { %p1114_p11 = pnand %p1113_p9, %p1107_p10 }
 0x278   : > { %1117 = shalt.err (!%p1114_p11)
}
 0x279   : > { %s1118_s13 = scalar_lea.hbm %s1561_s8, 256  ;;  %s1122_s20 = scalar_lea.hbm %s1621_s6, 512 }
 0x27a   : > { %p1119_p8 = scmp.ne.s32.totalorder %s1561_s8, %s1118_s13  ;;  %p1123_p7 = scmp.lt.u32.totalorder %s1561_s8, %s1621_s6 }
 0x27b   : > { %p1124_p12 = scmp.lt.u32.totalorder %s1122_s20, %s1118_s13  ;;  %p1126_p1 = scmp.lt.u32.totalorder %s1118_s13, %s1561_s8 }
 0x27c   : > { %p1120_p13 = pnand %p1119_p8, %p1639_p2 }
 0x27d   : > { %p1125_p0 = por %p1124_p12, %p1123_p7 }
 0x27e   : > { %p1121_p5 = pneg %p1120_p13 }
 0x27f   : > { %p1127_p6 = por %p1126_p1, %p1125_p0 }
 0x281   : > { %p1128_p10 = pnand %p1127_p6, %p1121_p5 }
 0x283   : > { %1131 = shalt.err (!%p1128_p10)
}
 0x284   : > { %863 = dma.vmem_to_hbm [thread:$0]  (%p1639_p2), %s1554_s15, 256, %s1561_s8, %s1476_s29, %s1640_s27, %s1640_s27, %s1217_s19  }
 0x285 PF: > { %s617_s14 = sand.u32 1, %s1174_s21   ;;  %p1644_p3 = scmp.ne.s32.totalorder %s1630_s30, 0 }
 0x286   : > { %p1645_p4 = scmp.ge.s32.totalorder %s1194_s26, 2  ;;  %s618_s16 = scalar_lea.sflag [#allocation5], %s617_s14 }
 0x288   : > { %p879_p9 = pnand %p1645_p4, %p1644_p3 }
 0x28a   : > { %1165 = dma.done.wait (!%p879_p9), %s618_s16, 512  }
 0x28b   : > { %1167 = vsyncadd (!%p879_p9), %s618_s16, 4294966784  ;;  %s1646_s10 = sadd.s32 4294967294, %s1194_s26  }
 0x28c   : > { %s626_s7 = sand.u32 1, %s1646_s10  }
 0x28d   : > { %s627_s24 = scalar_lea.sflag [#allocation11], %s626_s7 }
 0x28e   : > { %1169 = dma.done.wait (!%p879_p9), %s627_s24, 512  }
 0x28f   : > { %1171 = vsyncadd (!%p879_p9), %s627_s24, 4294966784  ;;  %s27_s26 = sadd.s32 1, %s1194_s26   ;;  %s1647_s21 = smov %s1178_s22 }
 0x290   : > { %p24_p2 = scmp.ge.s32.totalorder %s27_s26, 4   ;;  %s1648_s22 = smov %s1182_s23 }
 0x291   : > { %s1649_s23 = smov %s1395_s17  ;;  %s1650_s24 = smov %s1190_s25 }
 0x292   : > { %s1651_s25 = smov %s1653_s11  ;;  %26 = sbr.rel (!%p24_p2) target bundleno = 9 (0x9), region = 139 }
 0x299   :  { %641 = vsyncpa [#allocation4], 1 }
 0x29a   :  { %643 = vsyncpa [#allocation4 + $0x1], 1 }
 0x29b   :  { %644 = vsyncpa [#allocation7], 1 }
 0x29c   :  { %645 = vsyncpa [#allocation5], 1 }
 0x29d   :  { %647 = vsyncpa [#allocation5 + $0x1], 1 }
 0x29e   :  { %648 = vsyncpa [#allocation11], 1 }
 0x29f   :  { %650 = vsyncpa [#allocation11 + $0x1], 1 }

</bundles_post_ra>
